<compile_context>
chip_gen: v6e
topology: v6e:2x2x1
jax: 0.10.0
libtpu: 0.0.40
codegen_flags: <defaults>
</compile_context>

<pallas_src>
import jax
import jax.numpy as jnp
from jax.experimental import pallas as pl
from jax.experimental.pallas import tpu as pltpu


def _attention_kernel(x_ref, w_ref, rep_ref, att_ref):
    # x_ref:   (BB, T, H) batch tile
    # w_ref:   (1, H)     attention weight vector
    # rep_ref: (BB, H)
    # att_ref: (BB, T)
    x = x_ref[...].astype(jnp.float32)        # (BB, T, H)
    w = w_ref[...].astype(jnp.float32)        # (1, H) -> broadcasts over (BB, T)

    # scores: VPU multiply + lane-reduce over H -> (BB, T), then relu.
    # T lands on the lane axis, so the softmax below and the attention store
    # are lane-dense.
    s = jnp.maximum(jnp.sum(x * w, axis=-1), 0.0)      # (BB, T)

    # softmax over T (numerically stable)
    m = jnp.max(s, axis=-1, keepdims=True)             # (BB, 1)
    e = jnp.exp(s - m)                                 # (BB, T)
    denom = jnp.sum(e, axis=-1, keepdims=True)         # (BB, 1)

    # EUP approximate reciprocal + one Newton step (restores ~f32 accuracy
    # while keeping the divide off the VALU slots).
    inv = pl.reciprocal(denom, approx=True)
    inv = inv * (2.0 - denom * inv)
    a = e * inv                                        # (BB, T)

    att_ref[...] = a.astype(att_ref.dtype)

    # Weighted sum over T on the VPU: broadcast a over H, multiply, sublane
    # reduce over T.  Stays comfortably under the DMA time for the block.
    rep = jnp.sum(x * a[:, :, None], axis=1)           # (BB, H)
    rep_ref[...] = rep.astype(rep_ref.dtype)


def _choose_block_b(B, T, H, itemsize):
    """Pick the per-step batch tile BB.

    Big enough to amortize the ~0.35us/step pipeline overhead with multi-MiB
    DMAs, small enough that the double-buffered input block fits comfortably
    inside the most conservative scoped-VMEM budgets (v5e 16 MiB default,
    v7x 64 MiB physical), and leaving >=2 grid steps when B allows so the
    "parallel" batch axis can shard across v7x's two TensorCores.
    """
    target_block_bytes = 4 * 1024 * 1024      # ~4 MiB per input block
    per_b_bytes = max(1, T * H * itemsize)
    bb = max(1, target_block_bytes // per_b_bytes)
    bb = min(bb, B)
    if B >= 16:
        bb = min(bb, B // 2)                  # keep at least 2 grid steps
    if bb >= 8:
        bb -= bb % 8                          # sublane-friendly multiple of 8
    return max(1, int(bb))


def attention_forward(inputs, att_weights, *, block_b=None):
    """inputs: (B, T, H); att_weights: (1, H).  Returns (reps (B,H), att (B,T))."""
    B, T, H = inputs.shape
    itemsize = jnp.dtype(inputs.dtype).itemsize
    if block_b is None:
        block_b = _choose_block_b(B, T, H, itemsize)

    num_blocks = pl.cdiv(B, block_b)
    b_pad = num_blocks * block_b
    if b_pad != B:
        # Zero padding is safe: relu(0)=0 -> uniform softmax, rows sliced off below.
        inputs = jnp.pad(inputs, ((0, b_pad - B), (0, 0), (0, 0)))

    rep, att = pl.pallas_call(
        _attention_kernel,
        out_shape=(
            jax.ShapeDtypeStruct((b_pad, H), inputs.dtype),
            jax.ShapeDtypeStruct((b_pad, T), inputs.dtype),
        ),
        grid_spec=pltpu.PrefetchScalarGridSpec(
            num_scalar_prefetch=0,
            grid=(num_blocks,),
            in_specs=[
                pl.BlockSpec((block_b, T, H), lambda b: (b, 0, 0)),
                pl.BlockSpec((1, H), lambda b: (0, 0)),
            ],
            out_specs=[
                pl.BlockSpec((block_b, H), lambda b: (b, 0)),
                pl.BlockSpec((block_b, T), lambda b: (b, 0)),
            ],
        ),
        compiler_params=pltpu.CompilerParams(
            dimension_semantics=("parallel",),
        ),
    )(inputs, att_weights)

    if b_pad != B:
        rep = rep[:B]
        att = att[:B]
    return rep, att


def attention_reference(inputs, att_weights):
    # Pure-JAX mirror of the PyTorch forward (batch_first=True).
    scores = jnp.einsum("bth,h->bt", inputs, att_weights[0])
    att = jax.nn.softmax(jax.nn.relu(scores), axis=-1)
    rep = jnp.sum(inputs * att[..., None], axis=1)
    return rep, att


if __name__ == "__main__":
    # Small but batched shapes: B=16 gives a batch tile of 8 rows and a
    # 2-step "parallel" grid (exercises the tiled path + output slicing).
    B, T, H = 16, 8, 32

    key = jax.random.PRNGKey(0)
    k_x, k_w = jax.random.split(key)

    inputs = jax.random.normal(k_x, (B, T, H), dtype=jnp.float32)

    # nn.init.uniform_(weight, -stdv, stdv) with stdv = 1/sqrt(hidden_size)
    stdv = 1.0 / jnp.sqrt(jnp.float32(H))
    att_weights = jax.random.uniform(
        k_w, (1, H), dtype=jnp.float32, minval=-stdv, maxval=stdv
    )

    rep, att = attention_forward(inputs, att_weights)
    rep = jax.block_until_ready(rep)
    att = jax.block_until_ready(att)

    rep_ref, att_ref = attention_reference(inputs, att_weights)
    assert jnp.allclose(att, att_ref, atol=1e-4, rtol=1e-4), "att mismatch"
    assert jnp.allclose(rep, rep_ref, atol=1e-4, rtol=1e-4), "rep mismatch"

    print("KERNEL_OK")
</pallas_src>

<mosaic_0001>
module attributes {stable_mosaic.version = 11 : i64} {
  func.func @_attention_kernel(%arg0: i32, %arg1: memref<8x8x32xf32, #tpu.memory_space<vmem>>, %arg2: memref<1x32xf32, #tpu.memory_space<vmem>>, %arg3: memref<8x32xf32, #tpu.memory_space<vmem>>, %arg4: memref<8x8xf32, #tpu.memory_space<vmem>>) attributes {dimension_semantics = [#tpu.dimension_semantics<parallel>], iteration_bounds = array<i64: 2>, scalar_prefetch = 0 : i64, scratch_operands = 0 : i64, tpu.core_type = #tpu.core_type<tc>, window_params = [{transform_indices = @transform_0, window_bounds = array<i64: 8, 8, 32>}, {pipeline_mode = #tpu.pipeline_mode<synchronous>, transform_indices = @transform_1, window_bounds = array<i64: 1, 32>}, {transform_indices = @transform_2, window_bounds = array<i64: 8, 32>}, {transform_indices = @transform_3, window_bounds = array<i64: 8, 8>}]} {
    %c0 = arith.constant 0 : index
    %c0_0 = arith.constant 0 : index
    %c0_1 = arith.constant 0 : index
    %0 = vector.load %arg1[%c0, %c0_0, %c0_1] : memref<8x8x32xf32, #tpu.memory_space<vmem>>, vector<8x8x32xf32>
    %c0_2 = arith.constant 0 : index
    %c0_3 = arith.constant 0 : index
    %1 = vector.load %arg2[%c0_2, %c0_3] : memref<1x32xf32, #tpu.memory_space<vmem>>, vector<1x32xf32>
    %2 = vector.shape_cast %1 : vector<1x32xf32> to vector<1x1x32xf32>
    %3 = vector.broadcast %2 : vector<1x1x32xf32> to vector<8x8x32xf32>
    %4 = arith.mulf %0, %3 : vector<8x8x32xf32>
    %cst = arith.constant dense<0.000000e+00> : vector<8x8xf32>
    %5 = vector.multi_reduction <add>, %4, %cst [2] : vector<8x8x32xf32> to vector<8x8xf32>
    %cst_4 = arith.constant 0.000000e+00 : f32
    %6 = vector.broadcast %cst_4 : f32 to vector<8x8xf32>
    %7 = arith.maximumf %5, %6 : vector<8x8xf32>
    %cst_5 = arith.constant dense<0xFF800000> : vector<8xf32>
    %8 = vector.multi_reduction <maximumf>, %7, %cst_5 [1] : vector<8x8xf32> to vector<8xf32>
    %9 = vector.shape_cast %8 : vector<8xf32> to vector<8x1xf32>
    %10 = vector.broadcast %9 : vector<8x1xf32> to vector<8x8xf32>
    %11 = arith.subf %7, %10 : vector<8x8xf32>
    %12 = math.exp %11 : vector<8x8xf32>
    %cst_6 = arith.constant dense<0.000000e+00> : vector<8xf32>
    %13 = vector.multi_reduction <add>, %12, %cst_6 [1] : vector<8x8xf32> to vector<8xf32>
    %14 = vector.shape_cast %13 : vector<8xf32> to vector<8x1xf32>
    %15 = tpu.reciprocal %14 {approx = true} : vector<8x1xf32> -> vector<8x1xf32>
    %16 = arith.mulf %14, %15 : vector<8x1xf32>
    %cst_7 = arith.constant 2.000000e+00 : f32
    %17 = vector.broadcast %cst_7 : f32 to vector<8x1xf32>
    %18 = arith.subf %17, %16 : vector<8x1xf32>
    %19 = arith.mulf %15, %18 : vector<8x1xf32>
    %20 = vector.broadcast %19 : vector<8x1xf32> to vector<8x8xf32>
    %21 = arith.mulf %12, %20 : vector<8x8xf32>
    %c0_8 = arith.constant 0 : index
    %c0_9 = arith.constant 0 : index
    %22 = vector.load %arg4[%c0_8, %c0_9] : memref<8x8xf32, #tpu.memory_space<vmem>>, vector<8x8xf32>
    tpu.vector_store %arg4[%c0_8, %c0_9], %21 {strides = array<i32>} : memref<8x8xf32, #tpu.memory_space<vmem>>, vector<8x8xf32>,
    %23 = vector.shape_cast %21 : vector<8x8xf32> to vector<8x8x1xf32>
    %24 = vector.broadcast %23 : vector<8x8x1xf32> to vector<8x8x32xf32>
    %25 = arith.mulf %0, %24 : vector<8x8x32xf32>
    %cst_10 = arith.constant dense<0.000000e+00> : vector<8x32xf32>
    %26 = vector.multi_reduction <add>, %25, %cst_10 [1] : vector<8x8x32xf32> to vector<8x32xf32>
    %c0_11 = arith.constant 0 : index
    %c0_12 = arith.constant 0 : index
    %27 = vector.load %arg3[%c0_11, %c0_12] : memref<8x32xf32, #tpu.memory_space<vmem>>, vector<8x32xf32>
    tpu.vector_store %arg3[%c0_11, %c0_12], %26 {strides = array<i32>} : memref<8x32xf32, #tpu.memory_space<vmem>>, vector<8x32xf32>,
    return
  }
  func.func @transform_0(%arg0: i32) -> (i32, i32, i32) {
    %c0_i32 = arith.constant 0 : i32
    %c0_i32_0 = arith.constant 0 : i32
    %c0_i32_1 = arith.constant 0 : i32
    return %arg0, %c0_i32, %c0_i32_0 : i32, i32, i32
  }
  func.func @transform_1(%arg0: i32) -> (i32, i32) {
    %c0_i32 = arith.constant 0 : i32
    %c0_i32_0 = arith.constant 0 : i32
    %c0_i32_1 = arith.constant 0 : i32
    return %c0_i32, %c0_i32_0 : i32, i32
  }
  func.func @transform_2(%arg0: i32) -> (i32, i32) {
    %c0_i32 = arith.constant 0 : i32
    %c0_i32_0 = arith.constant 0 : i32
    return %arg0, %c0_i32 : i32, i32
  }
  func.func @transform_3(%arg0: i32) -> (i32, i32) {
    %c0_i32 = arith.constant 0 : i32
    %c0_i32_0 = arith.constant 0 : i32
    return %arg0, %c0_i32 : i32, i32
  }
}

</mosaic_0001>

<bundles_post_ra>
// kernel: tpu_custom_call.1
= control target key start
LH: loop header
LB: loop body
LE: loop exit
PB: predicated region body
PF: predicated region fallthrough
CT: control target
= control target key end

     0   :  { %9 = vsyncpa [#allocation3], 0  ;;  %s1299_s0 = inlined_call_operand.hbm [shape: f32[16,8,32], index: 0, kind: input, shape index: {}]   ;;  %s1300_s1 = inlined_call_operand.vmem [shape: f32[1,32], index: 1, kind: input, shape index: {}]   ;;  %s1301_s2 = inlined_call_operand.hbm [shape: f32[16,32], index: 2, kind: output, shape index: {0}]   ;;  %s1302_s3 = inlined_call_operand.vmem [shape: f32[16,8], index: 3, kind: output, shape index: {1}]  }
   0x1   :  { %11 = vsyncpa [#allocation3 + $0x1], 0 }
   0x2   :  { %12 = vsyncpa [#allocation4], 0 }
   0x3   :  { %14 = vsyncpa [#allocation4 + $0x1], 0  ;;  %s992_s12 = smov 0   ;;  %s994_s13 = smov 0  }
   0x4   :  { %s996_s14 = smov 0   ;;  %s998_s15 = smov 0  }
   0x5 LB: > { %s1013_s16 = sadd.s32 4294967295, %s965_s15   ;;  %s788_s17 = sadd.s32 4294967294, %s965_s15   ;;  %s965_s15 = sphi %s998_s15, %s1317_s15   ;;  %s961_s14 = sphi %s996_s14, %s1316_s14   ;;  %s957_s13 = sphi %s994_s13, %s1315_s13   ;;  %s953_s12 = sphi %s992_s12, %s1314_s12  }
   0x6   : > { %s1017_s18 = sadd.s32 1, %s965_s15   ;;  %s27_s19 = sadd.s32 1, %s961_s14 }
   0x7   : > { %s24_s20 = ssub.s32 %s965_s15, %s1017_s18  ;;  %p34_p0 = scmp.ne.s32.totalorder %s961_s14, %s957_s13 }
   0x8   : > { %p25_p1 = scmp.eq.s32.totalorder %s24_s20, 0  ;;  %p35_p2 = scmp.eq.s32.totalorder %s965_s15, 0 }
   0x9   : > { %p40_p3 = scmp.ne.s32.totalorder %s957_s13, %s953_s12  ;;  %p41_p4 = scmp.eq.s32.totalorder %s1013_s16, 0 }
   0xa   : > { %s1029_s21 = scalar_select %p25_p1, %s961_s14, %s27_s19  }
   0xb   : > { %p1031_p5 = por %p35_p2, %p34_p0  ;;  %p1035_p6 = por %p41_p4, %p40_p3 }
   0xc   : > { %p85_p7 = scmp.eq.s32.totalorder %s1013_s16, 1  ;;  %p91_p8 = scmp.eq.s32.totalorder %s788_s17, 1 }
   0xd   : > { %s1306_s23 = scalar_select %p1035_p6, 1, 0 }
   0xe   : > { %p816_p10 = scmp.lt.s32.totalorder %s965_s15, 2  ;;  %p1042_p11 = por %p85_p7, %p34_p0 }
   0xf   : > { %p1046_p12 = por %p91_p8, %p40_p3  ;;  %s140_s26 = sand.u32 1, %s961_s14  }
  0x10   : > { %s1307_s24 = scalar_select %p1042_p11, 1, 0 }
  0x11   : > { %s1308_s25 = scalar_select %p1046_p12, 1, 0 }
  0x12   : > { %s803_s27 = sshll.u32 %s965_s15, 10  ;;  %s791_s28 = sshll.u32 %s140_s26, 6 }
  0x13   : > { %s1055_s4 = scalar_lea.hbm %s1299_s0, %s803_s27  ;;  %s144_s5 = scalar_lea.vmem [#allocation2], %s791_s28 }
  0x14   : > { %s151_s6 = sshll.u32 %s144_s5, 4  ;;  %p1059_p13 = pnand %p816_p10, %p1031_p5  ;;  %s1063_s6 = int_to_ptr.vmem [resolvable:$true] %s151_s6 }
  0x15   : > { %s1065_s8 = scalar_lea.sflag [#allocation3], %s140_s26  ;;  %s873_s9 = scalar_lea.hbm %s1055_s4, 1024 }
  0x16   : > { %p874_p0 = scmp.ne.s32.totalorder %s1055_s4, %s873_s9  ;;  %p875_p1 = pneg %p1059_p13 }
  0x17   : > { %s878_s17 = scalar_lea.hbm %s1299_s0, 2048  ;;  %p879_p4 = scmp.lt.s32.totalorder %s1055_s4, %s1299_s0 }
  0x18   : > { %p876_p2 = pnand %p875_p1, %p874_p0  ;;  %p880_p5 = scmp.lt.s32.totalorder %s878_s17, %s873_s9 }
  0x1a   : > { %p877_p3 = pneg %p876_p2  ;;  %p881_p7 = por %p880_p5, %p879_p4 }
  0x1c   : > { %p882_p8 = pnand %p881_p7, %p877_p3 }
  0x1e   : > { %885 = shalt.err (!%p882_p8)
}
  0x1f   : > { %s886_s22 = scalar_lea.vmem %s1063_s6, 1024  ;;  %s967_s26 = smov [#allocation2]  }
  0x20   : > { %p887_p10 = scmp.ne.s32.totalorder %s1063_s6, %s886_s22  ;;  %s891_s27 = sshll.u32 %s967_s26, 4  ;;  %s892_s27 = int_to_ptr.vmem [resolvable:$false] %s891_s27 }
  0x21   : > { %s893_s28 = scalar_lea.vmem %s892_s27, 2048  ;;  %p894_p2 = scmp.lt.s32.totalorder %s1063_s6, %s892_s27 }
  0x22   : > { %p889_p9 = pnand %p887_p10, %p875_p1  ;;  %p895_p12 = scmp.lt.s32.totalorder %s893_s28, %s886_s22 }
  0x24   : > { %p890_p0 = pneg %p889_p9  ;;  %p896_p11 = por %p895_p12, %p894_p2 }
  0x26   : > { %p897_p6 = pnand %p896_p11, %p890_p0 }
  0x28   : > { %900 = shalt.err (!%p897_p6)
}
  0x29   : > { %s968_s29 = smov 128   ;;  %s969_s30 = smov 8  }
  0x2a   : > { %811 = dma.hbm_to_vmem [thread:$0]  (!%p1059_p13), %s1055_s4, 1024, %s1063_s6, %s1065_s8, %s968_s29, %s968_s29, %s969_s30  }
  0x2b   : > { %p794_p9 = scmp.ge.s32.totalorder %s965_s15, 1  ;;  %p159_p1 = scmp.lt.s32.totalorder %s965_s15, 3 }
  0x2d   : > { %p160_p3 = pnand %p794_p9, %p159_p1 }
  0x2e   : > { %s1089_s5 = sand.u32 (!%p160_p3), 1, %s957_s13   ;;  %p1310_p6 = scmp.ne.s32.totalorder (!%p160_p3), %s1306_s23, 0 }
  0x2f   : > { %163 = sbr.rel (%p160_p3) target bundleno = 868 (0x364), region = 28  ;;  %s795_s9 = sshll.u32 (!%p160_p3), %s1089_s5, 6 }
  0x30   : > { %s166_s10 = scalar_lea.sflag (!%p160_p3), [#allocation3], %s1089_s5  ;;  %s169_s11 = scalar_lea.vmem (!%p160_p3), [#allocation2], %s795_s9 }
  0x34   : > { %944 = dma.done.wait (%p1310_p6), %s166_s10, 1024  }
  0x35   : > { %946 = vsyncadd (%p1310_p6), %s166_s10, 4294966272  ;;  %v1097_v0 = vld [vmem:[%s169_s11] sm:$0xff]  ;;  %vm224_vm0 = vcmask 261120   ;;  %v1102_v2 = vld [vmem:[%s169_s11 + $0x10] sm:$0xff]  ;;  %v265_v25 = vlaneseq  ;;  %vm299_vm1 = vcmask 1041409   ;;  %vm301_vm2 = vcmask 1042434  }
  0x36   : > { %v798_v1 = vld [vmem:[%s1300_s1] ss:$0 sm:$0xff]  ;;  %v1106_v5 = vld [vmem:[%s169_s11 + $0x8] sm:$0xff]  ;;  %v1108_v6 = vld [vmem:[%s169_s11 + $0x18] sm:$0xff]  ;;  %vm303_vm3 = vcmask 1043459   ;;  %vm305_vm4 = vcmask 1044484  }
  0x37   : > { %v216_v3 = vmul.f32 %v798_v1, %v1097_v0  ;;  %v218_v4 = vmul.f32 %v798_v1, %v1102_v2  ;;  %v217_v7 = vmul.f32 %v798_v1, %v1106_v5  ;;  %v219_v8 = vmul.f32 %v798_v1, %v1108_v6  ;;  %v1112_v9 = vld [vmem:[%s169_s11 + $0x20] sm:$0xff]  ;;  %v1114_v10 = vld [vmem:[%s169_s11 + $0x28] sm:$0xff]  ;;  %v1122_v17 = vld [vmem:[%s169_s11 + $0x30] sm:$0xff]  ;;  %p197_p11 = scmp.lt.s32.totalorder %s1013_s16, 1  ;;  %s796_s20 = sshll.u32 %s1089_s5, 3 }
  0x38   : > { %v220_v15 = vmul.f32 %v798_v1, %v1112_v9  ;;  %v221_v16 = vmul.f32 %v798_v1, %v1114_v10  ;;  %v1124_v18 = vld [vmem:[%s169_s11 + $0x38] sm:$0xff]  ;;  %v222_v21 = vmul.f32 %v798_v1, %v1122_v17  ;;  %v266_v26 = vand.u32 127, %v265_v25  ;;  %s800_s22 = sshll.u32 %s1013_s16, 7  ;;  %s189_s26 = scalar_lea.vmem [#allocation5], %s796_s20 }
  0x39   : > { %v225_v11 = vsel %vm224_vm0, %v216_v3, 0.0  ;;  %v231_v12 = vsel %vm224_vm0, %v218_v4, 0.0  ;;  %v228_v13 = vsel %vm224_vm0, %v217_v7, 0.0  ;;  %v234_v14 = vsel %vm224_vm0, %v219_v8, 0.0  ;;  %s1225_s23 = scalar_select %p197_p11, %s1013_s16, 1 }
  0x3a   : > { %226 = vadd.xlane.f32.xlu0 %v225_v11  ;;  %232 = vadd.xlane.f32.xlu1 %v231_v12  ;;  %v237_v19 = vsel %vm224_vm0, %v220_v15, 0.0  ;;  %v240_v20 = vsel %vm224_vm0, %v221_v16, 0.0  ;;  %v223_v22 = vmul.f32 %v798_v1, %v1124_v18  ;;  %v243_v23 = vsel %vm224_vm0, %v222_v21, 0.0  ;;  %s691_s27 = sshll.u32 %s189_s26, 4  ;;  %s1260_s30 = scalar_lea.hbm %s1301_s2, %s800_s22  ;;  %s692_s27 = int_to_ptr.vmem [resolvable:$true] %s691_s27 }
  0x3b   : > { %v1132_v27 = vshrl.u32 %v265_v25, 7  ;;  %vm307_vm5 = vcmask 1045509   ;;  %vm309_vm6 = vcmask 1046534   ;;  %vm311_vm7 = vcmask 1047559   ;;  %s797_s7 = sshll.u32 %s1225_s23, 3  ;;  %s674_s16 = scalar_lea.sflag [#allocation4], %s1089_s5 }
  0x3c   : > { %v246_v24 = vsel %vm224_vm0, %v223_v22, 0.0  ;;  %vm314_vm8 = vcmask 64512   ;;  %v970_v61 = vmov 0   ;;  %s200_s19 = scalar_lea.vmem %s1302_s3, %s797_s7  ;;  %s901_s9 = scalar_lea.vmem %s692_s27, 128 }
  0x3d   : > { %v1135_v30 = vsub.s32 %v266_v26, %v1132_v27  ;;  %854 = vset.pattern.permute.xlu0 %v970_v61  ;;  %853 = vset.pattern.permute.xlu1 %v970_v61  ;;  %v321_v62 = vsub.s32 0, %v1132_v27  ;;  %v325_v63 = vsub.s32 1, %v1132_v27  ;;  %v329_v1 = vsub.s32 2, %v1132_v27  ;;  %p902_p12 = scmp.ne.s32.totalorder %s692_s27, %s901_s9  ;;  %p1311_p13 = scmp.ne.s32.totalorder %s1307_s24, 0 }
  0x3e   : > { %229 = vadd.xlane.f32.xlu0 %v228_v13  ;;  %235 = vadd.xlane.f32.xlu1 %v234_v14  ;;  %v333_v3 = vsub.s32 3, %v1132_v27  ;;  %v337_v12 = vsub.s32 4, %v1132_v27  ;;  %v341_v21 = vsub.s32 5, %v1132_v27  ;;  %v345_v25 = vsub.s32 6, %v1132_v27  ;;  %s971_s10 = smov [#allocation5]  }
  0x3f   : > { %p903_p4 = pnand %p902_p12, %p1311_p13  ;;  %s905_s11 = sshll.u32 %s971_s10, 4  ;;  %s906_s11 = int_to_ptr.vmem [resolvable:$false] %s905_s11 }
  0x40   : > { %s907_s4 = scalar_lea.vmem %s906_s11, 256  ;;  %p908_p7 = scmp.lt.s32.totalorder %s692_s27, %s906_s11 }
  0x41   : > { %p904_p5 = pneg %p903_p4  ;;  %p909_p8 = scmp.lt.s32.totalorder %s907_s4, %s901_s9 }
  0x42   : > { %238 = vadd.xlane.f32.xlu0 %v237_v19  ;;  %241 = vadd.xlane.f32.xlu1 %v240_v20 }
  0x43   : > { %p910_p10 = por %p909_p8, %p908_p7 }
  0x45   : > { %p911_p0 = pnand %p910_p10, %p904_p5 }
  0x46   : > { %244 = vadd.xlane.f32.xlu0 %v243_v23  ;;  %247 = vadd.xlane.f32.xlu1 %v246_v24 }
  0xc3   : > { %v227_v28 = vpop.xlane.xlu0 %226  ;;  %v233_v29 = vpop.xlane.xlu1 %232 }
  0xc4   : > { %v249_v31 = vmax.f32 %v227_v28, 0.0  ;;  %v251_v32 = vmax.f32 %v233_v29, 0.0 }
  0xc6   : > { %v270_v37 = vrot.slane %v249_v31, %v1135_v30  ;;  %v278_v40 = vrot.slane %v251_v32, %v1135_v30 }
  0xc7   : > { %v230_v33 = vpop.xlane.xlu0 %229  ;;  %v236_v34 = vpop.xlane.xlu1 %235 }
  0xc8   : > { %v250_v35 = vmax.f32 %v230_v33, 0.0  ;;  %v252_v36 = vmax.f32 %v236_v34, 0.0 }
  0xca   : > { %v274_v38 = vrot.slane %v250_v35, %v1135_v30  ;;  %v282_v39 = vrot.slane %v252_v36, %v1135_v30 }
  0xcb   : > { %v239_v41 = vpop.xlane.xlu0 %238  ;;  %v242_v42 = vpop.xlane.xlu1 %241 }
  0xcc   : > { %v300_v43 = vsel %vm299_vm1, %v274_v38, %v270_v37  ;;  %v253_v44 = vmax.f32 %v239_v41, 0.0  ;;  %v254_v45 = vmax.f32 %v242_v42, 0.0 }
  0xcd   : > { %v302_v46 = vsel %vm301_vm2, %v278_v40, %v300_v43 }
  0xce   : > { %v304_v47 = vsel %vm303_vm3, %v282_v39, %v302_v46  ;;  %v286_v48 = vrot.slane %v253_v44, %v1135_v30  ;;  %v290_v49 = vrot.slane %v254_v45, %v1135_v30 }
  0xcf   : > { %v245_v50 = vpop.xlane.xlu0 %244  ;;  %v248_v51 = vpop.xlane.xlu1 %247 }
  0xd0   : > { %v306_v52 = vsel %vm305_vm4, %v286_v48, %v304_v47  ;;  %v255_v53 = vmax.f32 %v245_v50, 0.0  ;;  %v256_v54 = vmax.f32 %v248_v51, 0.0 }
  0xd1   : > { %v308_v57 = vsel %vm307_vm5, %v290_v49, %v306_v52 }
  0xd2   : > { %v294_v55 = vrot.slane %v255_v53, %v1135_v30  ;;  %v298_v56 = vrot.slane %v256_v54, %v1135_v30 }
  0xd4   : > { %v310_v58 = vsel %vm309_vm6, %v294_v55, %v308_v57 }
  0xd5   : > { %v312_v59 = vsel %vm311_vm7, %v298_v56, %v310_v58 }
  0xd6   : > { %v315_v60 = vsel %vm314_vm8, %v312_v59, -inf }
  0xd7   : > { %316 = vmax.xlane.f32.xlu0 %v315_v60 }
 0x160   : > { %v317_v4 = vpop.xlane.xlu0 %316 }
 0x161   : > { %v322_v7 = vrot.slane %v317_v4, %v321_v62  ;;  %v326_v8 = vrot.slane %v317_v4, %v325_v63  ;;  %v330_v11 = vrot.slane %v317_v4, %v329_v1  ;;  %v334_v13 = vrot.slane %v317_v4, %v333_v3 }
 0x162   : > { %v338_v22 = vrot.slane %v317_v4, %v337_v12  ;;  %v342_v26 = vrot.slane %v317_v4, %v341_v21 }
 0x163   : > { %v359_v14 = vsub.f32 %v249_v31, %v322_v7  ;;  %v360_v15 = vsub.f32 %v250_v35, %v326_v8  ;;  %v361_v16 = vsub.f32 %v251_v32, %v330_v11  ;;  %v362_v23 = vsub.f32 %v252_v36, %v334_v13 }
 0x164   : > { %v363_v28 = vsub.f32 %v253_v44, %v338_v22  ;;  %v349_v31 = vsub.s32 7, %v1132_v27  ;;  %v346_v32 = vrot.slane %v317_v4, %v345_v25  ;;  %v364_v33 = vsub.f32 %v254_v45, %v342_v26 }
 0x165   : > { %v367_v19 = vmul.f32 1.442695, %v359_v14  ;;  %v369_v20 = vmul.f32 1.442695, %v360_v15  ;;  %v371_v24 = vmul.f32 1.442695, %v361_v16 }
 0x166   : > { %v373_v29 = vmul.f32 1.442695, %v362_v23  ;;  %v375_v34 = vmul.f32 1.442695, %v363_v28  ;;  %v350_v35 = vrot.slane %v317_v4, %v349_v31  ;;  %v365_v36 = vsub.f32 %v255_v53, %v346_v32 }
 0x167   : > { %855 = vpow2.f32 %v367_v19  ;;  %v377_v37 = vmul.f32 1.442695, %v364_v33 }
 0x168   : > { %857 = vpow2.f32 %v369_v20  ;;  %v366_v40 = vsub.f32 %v256_v54, %v350_v35  ;;  %v379_v41 = vmul.f32 1.442695, %v365_v36 }
 0x169   : > { %859 = vpow2.f32 %v371_v24 }
 0x16a   : > { %861 = vpow2.f32 %v373_v29  ;;  %v381_v43 = vmul.f32 1.442695, %v366_v40 }
 0x16b   : > { %863 = vpow2.f32 %v375_v34 }
 0x16c   : > { %865 = vpow2.f32 %v377_v37 }
 0x16d   : > { %867 = vpow2.f32 %v379_v41 }
 0x16e   : > { %869 = vpow2.f32 %v381_v43 }
 0x174   : > { %v856_v38 = vpop.eup %855 }
 0x175   : > { %v858_v39 = vpop.eup %857  ;;  %392 = vperm.xlu1 %853, %v856_v38  }
 0x176   : > { %395 = vperm.xlu0 %854, %v858_v39   ;;  %v860_v42 = vpop.eup %859 }
 0x177   : > { %v862_v44 = vpop.eup %861 }
 0x178   : > { %v864_v45 = vpop.eup %863 }
 0x179   : > { %398 = vperm.xlu1 %853, %v860_v42   ;;  %v866_v46 = vpop.eup %865 }
 0x17a   : > { %v868_v47 = vpop.eup %867 }
 0x17b   : > { %v870_v48 = vpop.eup %869 }
 0x17d   : > { %401 = vperm.xlu1 %853, %v862_v44  }
 0x181   : > { %404 = vperm.xlu1 %853, %v864_v45  }
 0x185   : > { %407 = vperm.xlu1 %853, %v866_v46  }
 0x189   : > { %410 = vperm.xlu1 %853, %v868_v47  }
 0x18d   : > { %413 = vperm.xlu1 %853, %v870_v48  }
 0x1f0   : > { %v393_v49 = vpop.permute.xlu1 %392 }
 0x1f1   : > { %v396_v53 = vpop.permute.xlu0 %395  ;;  %v418_v56 = vrot.slane %v393_v49, %v1135_v30 }
 0x1f2   : > { %v422_v55 = vrot.slane %v396_v53, %v1135_v30 }
 0x1f4   : > { %v399_v50 = vpop.permute.xlu1 %398  ;;  %v447_v61 = vsel %vm299_vm1, %v422_v55, %v418_v56 }
 0x1f5   : > { %v426_v57 = vrot.slane %v399_v50, %v1135_v30 }
 0x1f7   : > { %v448_v7 = vsel %vm301_vm2, %v426_v57, %v447_v61 }
 0x1f8   : > { %v402_v51 = vpop.permute.xlu1 %401 }
 0x1f9   : > { %v430_v58 = vrot.slane %v402_v51, %v1135_v30 }
 0x1fb   : > { %v449_v11 = vsel %vm303_vm3, %v430_v58, %v448_v7 }
 0x1fc   : > { %v405_v52 = vpop.permute.xlu1 %404 }
 0x1fd   : > { %v434_v59 = vrot.slane %v405_v52, %v1135_v30 }
 0x1ff   : > { %v450_v13 = vsel %vm305_vm4, %v434_v59, %v449_v11 }
 0x200   : > { %v408_v54 = vpop.permute.xlu1 %407 }
 0x201   : > { %v438_v4 = vrot.slane %v408_v54, %v1135_v30 }
 0x203   : > { %v451_v15 = vsel %vm307_vm5, %v438_v4, %v450_v13 }
 0x204   : > { %v411_v60 = vpop.permute.xlu1 %410 }
 0x205   : > { %v442_v8 = vrot.slane %v411_v60, %v1135_v30 }
 0x207   : > { %v452_v19 = vsel %vm309_vm6, %v442_v8, %v451_v15 }
 0x208   : > { %v414_v14 = vpop.permute.xlu1 %413 }
 0x209   : > { %v446_v16 = vrot.slane %v414_v14, %v1135_v30 }
 0x20b   : > { %v453_v20 = vsel %vm311_vm7, %v446_v16, %v452_v19 }
 0x20c   : > { %v455_v22 = vsel %vm314_vm8, %v453_v20, 0.0 }
 0x20d   : > { %456 = vadd.xlane.f32.xlu1 %v455_v22 }
 0x296   : > { %v457_v23 = vpop.xlane.xlu1 %456 }
 0x297   : > { %871 = vrcp.f32 %v457_v23 }
 0x2a4   : > { %v872_v24 = vpop.eup %871 }
 0x2a5   : > { %v459_v26 = vmul.f32 %v872_v24, %v457_v23 }
 0x2a7   : > { %v460_v28 = vsub.f32 2.0, %v459_v26 }
 0x2a9   : > { %v461_v29 = vmul.f32 %v872_v24, %v460_v28 }
 0x2ab   : > { %v466_v32 = vrot.slane %v461_v29, %v321_v62  ;;  %v470_v34 = vrot.slane %v461_v29, %v325_v63  ;;  %v474_v36 = vrot.slane %v461_v29, %v329_v1  ;;  %v478_v40 = vrot.slane %v461_v29, %v333_v3 }
 0x2ac   : > { %v482_v43 = vrot.slane %v461_v29, %v337_v12  ;;  %v486_v63 = vrot.slane %v461_v29, %v341_v21  ;;  %v490_v1 = vrot.slane %v461_v29, %v345_v25  ;;  %v494_v3 = vrot.slane %v461_v29, %v349_v31 }
 0x2ad   : > { %v503_v33 = vmul.f32 %v856_v38, %v466_v32  ;;  %v504_v35 = vmul.f32 %v858_v39, %v470_v34  ;;  %v505_v37 = vmul.f32 %v860_v42, %v474_v36  ;;  %v506_v41 = vmul.f32 %v862_v44, %v478_v40 }
 0x2ae   : > { %v507_v62 = vmul.f32 %v864_v45, %v482_v43  ;;  %v508_v38 = vmul.f32 %v866_v46, %v486_v63  ;;  %v509_v39 = vmul.f32 %v868_v47, %v490_v1  ;;  %v510_v42 = vmul.f32 %v870_v48, %v494_v3 }
 0x2af   : > { %520 = vperm.xlu0 %854, %v503_v33  }
 0x2b3   : > { %523 = vperm.xlu0 %854, %v504_v35  }
 0x2b7   : > { %526 = vperm.xlu0 %854, %v505_v37  }
 0x2bb   : > { %529 = vperm.xlu0 %854, %v506_v41  }
 0x2bf   : > { %532 = vperm.xlu0 %854, %v507_v62  }
 0x2c3   : > { %535 = vperm.xlu0 %854, %v508_v38  }
 0x2c7   : > { %538 = vperm.xlu0 %854, %v509_v39  }
 0x2cb   : > { %541 = vperm.xlu0 %854, %v510_v42  }
 0x32a   : > { %v521_v44 = vpop.permute.xlu0 %520 }
 0x32b   : > { %v592_v49 = vmul.f32 %v521_v44, %v1097_v0  ;;  %v546_v4 = vrot.slane %v521_v44, %v1135_v30 }
 0x32d   : > { %v600_v47 = vsel %vm224_vm0, %v592_v49, 0.0 }
 0x32e   : > { %v524_v12 = vpop.permute.xlu0 %523  ;;  %v601_v51 = vrot.slane %v600_v47, 4 }
 0x32f   : > { %v593_v45 = vmul.f32 %v524_v12, %v1106_v5 }
 0x330   : > { %v602_v55 = vadd.f32 %v601_v51, %v600_v47 }
 0x331   : > { %v607_v25 = vsel %vm224_vm0, %v593_v45, 0.0 }
 0x332   : > { %v527_v21 = vpop.permute.xlu0 %526  ;;  %v608_v50 = vrot.slane %v607_v25, 4 }
 0x333   : > { %v594_v46 = vmul.f32 %v527_v21, %v1102_v2  ;;  %v554_v8 = vrot.slane %v527_v21, %v1135_v30 }
 0x334   : > { %v609_v2 = vadd.f32 %v608_v50, %v607_v25 }
 0x335   : > { %v614_v27 = vsel %vm224_vm0, %v594_v46, 0.0 }
 0x336   : > { %v530_v31 = vpop.permute.xlu0 %529  ;;  %v615_v52 = vrot.slane %v614_v27, 4  ;;  %v610_v7 = vrot.slane %v609_v2, 2 }
 0x337   : > { %v595_v48 = vmul.f32 %v530_v31, %v1108_v6  ;;  %v550_v6 = vrot.slane %v524_v12, %v1135_v30  ;;  %v558_v14 = vrot.slane %v530_v31, %v1135_v30 }
 0x338   : > { %v616_v56 = vadd.f32 %v615_v52, %v614_v27  ;;  %v611_v28 = vadd.f32 %v610_v7, %v609_v2 }
 0x339   : > { %v621_v5 = vsel %vm224_vm0, %v595_v48, 0.0  ;;  %v575_v22 = vsel %vm299_vm1, %v550_v6, %v546_v4 }
 0x33a   : > { %v622_v53 = vrot.slane %v621_v5, 4  ;;  %v533_v0 = vpop.permute.xlu0 %532  ;;  %v617_v13 = vrot.slane %v616_v56, 2  ;;  %v576_v29 = vsel %vm301_vm2, %v554_v8, %v575_v22  ;;  %v612_v3 = vrot.slane %v611_v28, 1 }
 0x33b   : > { %v596_v54 = vmul.f32 %v533_v0, %v1112_v9  ;;  %v603_v9 = vrot.slane %v602_v55, 2  ;;  %v562_v19 = vrot.slane %v533_v0, %v1135_v30  ;;  %v577_v36 = vsel %vm303_vm3, %v558_v14, %v576_v29 }
 0x33c   : > { %v623_v58 = vadd.f32 %v622_v53, %v621_v5  ;;  %v618_v35 = vadd.f32 %v617_v13, %v616_v56  ;;  %v613_v31 = vadd.f32 %v612_v3, %v611_v28 }
 0x33d   : > { %v628_v57 = vsel %vm224_vm0, %v596_v54, 0.0  ;;  %v604_v34 = vadd.f32 %v603_v9, %v602_v55  ;;  %v578_v41 = vsel %vm305_vm4, %v562_v19, %v577_v36 }
 0x33e   : > { %v629_v59 = vrot.slane %v628_v57, 4  ;;  %v536_v60 = vpop.permute.xlu0 %535  ;;  %v624_v16 = vrot.slane %v623_v58, 2  ;;  %v619_v45 = vrot.slane %v618_v35, 1 }
 0x33f   : > { %v597_v61 = vmul.f32 %v536_v60, %v1114_v10  ;;  %v566_v24 = vrot.slane %v536_v60, %v1135_v30  ;;  %v605_v46 = vrot.slane %v604_v34, 1 }
 0x340   : > { %v630_v11 = vadd.f32 %v629_v59, %v628_v57  ;;  %v625_v40 = vadd.f32 %v624_v16, %v623_v58  ;;  %v620_v51 = vadd.f32 %v619_v45, %v618_v35 }
 0x341   : > { %v635_v15 = vsel %vm224_vm0, %v597_v61, 0.0  ;;  %v579_v38 = vsel %vm307_vm5, %v566_v24, %v578_v41  ;;  %v606_v52 = vadd.f32 %v605_v46, %v604_v34 }
 0x342   : > { %v636_v20 = vrot.slane %v635_v15, 4  ;;  %v539_v10 = vpop.permute.xlu0 %538  ;;  %v631_v23 = vrot.slane %v630_v11, 2  ;;  %v626_v25 = vrot.slane %v625_v40, 1 }
 0x343   : > { %v598_v26 = vmul.f32 %v539_v10, %v1122_v17  ;;  %v570_v33 = vrot.slane %v539_v10, %v1135_v30  ;;  %v664_v2 = vsel %vm299_vm1, %v613_v31, %v606_v52 }
 0x344   : > { %v637_v32 = vadd.f32 %v636_v20, %v635_v15  ;;  %v632_v17 = vadd.f32 %v631_v23, %v630_v11  ;;  %v627_v5 = vadd.f32 %v626_v25, %v625_v40  ;;  %v665_v57 = vsel %vm301_vm2, %v620_v51, %v664_v2 }
 0x345   : > { %v642_v37 = vsel %vm224_vm0, %v598_v26, 0.0  ;;  %v580_v44 = vsel %vm309_vm6, %v570_v33, %v579_v38 }
 0x346   : > { %v638_v43 = vrot.slane %v637_v32, 2  ;;  %v643_v62 = vrot.slane %v642_v37, 4  ;;  %v542_v63 = vpop.permute.xlu0 %541  ;;  %v666_v59 = vsel %vm303_vm3, %v627_v5, %v665_v57 }
 0x347   : > { %v574_v1 = vrot.slane %v542_v63, %v1135_v30  ;;  %v599_v39 = vmul.f32 %v542_v63, %v1124_v18  ;;  %v633_v30 = vrot.slane %v632_v17, 1 }
 0x348   : > { %v639_v42 = vadd.f32 %v638_v43, %v637_v32  ;;  %v644_v12 = vadd.f32 %v643_v62, %v642_v37 }
 0x349   : > { %v581_v49 = vsel %vm311_vm7, %v574_v1, %v580_v44  ;;  %v649_v21 = vsel %vm224_vm0, %v599_v39, 0.0  ;;  %v634_v54 = vadd.f32 %v633_v30, %v632_v17 }
 0x34a   : > { %v645_v47 = vrot.slane %v644_v12, 2  ;;  %583 = vst.msk [vmem:[%s200_s19] sm:$0xff] %vm314_vm8, %v581_v49  ;;  %v650_v27 = vrot.slane %v649_v21, 4  ;;  %v640_v18 = vrot.slane %v639_v42, 1 }
 0x34b   : > { %v667_v6 = vsel %vm305_vm4, %v634_v54, %v666_v59 }
 0x34c   : > { %v646_v48 = vadd.f32 %v645_v47, %v644_v12  ;;  %v651_v50 = vadd.f32 %v650_v27, %v649_v21  ;;  %v641_v55 = vadd.f32 %v640_v18, %v639_v42 }
 0x34e   : > { %v647_v53 = vrot.slane %v646_v48, 1  ;;  %v652_v0 = vrot.slane %v651_v50, 2  ;;  %v668_v61 = vsel %vm307_vm5, %v641_v55, %v667_v6 }
 0x350   : > { %v653_v56 = vadd.f32 %v652_v0, %v651_v50  ;;  %v648_v58 = vadd.f32 %v647_v53, %v646_v48 }
 0x352   : > { %v654_v60 = vrot.slane %v653_v56, 1  ;;  %v669_v7 = vsel %vm309_vm6, %v648_v58, %v668_v61 }
 0x354   : > { %v655_v4 = vadd.f32 %v654_v60, %v653_v56 }
 0x356   : > { %v670_v8 = vsel %vm311_vm7, %v655_v4, %v669_v7 }
 0x357   : > { %672 = vst.msk [vmem:[%s189_s26] sm:$0xff] %vm224_vm0, %v670_v8 }
 0x358   : > { %914 = shalt.err (!%p911_p0)
}
 0x359   : > { %s915_s6 = scalar_lea.hbm %s1260_s30, 128  ;;  %s919_s7 = scalar_lea.hbm %s1301_s2, 256 }
 0x35a   : > { %p916_p2 = scmp.ne.s32.totalorder %s1260_s30, %s915_s6  ;;  %p920_p3 = scmp.lt.s32.totalorder %s1260_s30, %s1301_s2 }
 0x35b   : > { %p921_p6 = scmp.lt.s32.totalorder %s919_s7, %s915_s6 }
 0x35c   : > { %p917_p9 = pnand %p916_p2, %p1311_p13 }
 0x35d   : > { %p922_p11 = por %p921_p6, %p920_p3 }
 0x35e   : > { %p918_p1 = pneg %p917_p9 }
 0x360   : > { %p923_p12 = pnand %p922_p11, %p918_p1 }
 0x362   : > { %926 = shalt.err (!%p923_p12)
}
 0x363   : > { %806 = dma.vmem_to_hbm [thread:$0]  (%p1311_p13), %s692_s27, 128, %s1260_s30, %s674_s16  }
 0x364 PF: > { %s706_s19 = sand.u32 1, %s953_s12   ;;  %p1312_p4 = scmp.ne.s32.totalorder %s1308_s25, 0 }
 0x365   : > { %p1313_p5 = scmp.ge.s32.totalorder %s965_s15, 2  ;;  %s707_s20 = scalar_lea.sflag [#allocation4], %s706_s19 }
 0x367   : > { %p813_p7 = pnand %p1313_p5, %p1312_p4 }
 0x369   : > { %p814_p8 = pneg %p813_p7 }
 0x36b   : > { %948 = dma.done.wait (%p814_p8), %s707_s20, 128  }
 0x36c   : > { %950 = vsyncadd (%p814_p8), %s707_s20, 4294967168  ;;  %p17_p10 = scmp.ge.s32.totalorder %s1017_s18, 4   ;;  %s1314_s12 = smov %s957_s13 }
 0x36d   : > { %s1315_s13 = smov %s961_s14  ;;  %s1316_s14 = smov %s1029_s21 }
 0x36e   : > { %s1317_s15 = smov %s1017_s18  ;;  %19 = sbr.rel (!%p17_p10) target bundleno = 5 (0x5), region = 85 }
 0x373   :  { %719 = vsyncpa [#allocation3], 1 }
 0x374   :  { %721 = vsyncpa [#allocation3 + $0x1], 1 }
 0x375   :  { %722 = vsyncpa [#allocation4], 1 }
 0x376   :  { %724 = vsyncpa [#allocation4 + $0x1], 1 }

</bundles_post_ra>
